<compile_context>
chip_gen: v6e
topology: v6e:2x2x1
jax: 0.10.0
libtpu: 0.0.40
codegen_flags: <defaults>
</compile_context>

<pallas_src>
import jax
import jax.numpy as jnp
from jax.experimental import pallas as pl
from jax.experimental.pallas import tpu as pltpu

TARGET_TILE_BYTES = 8 * 1024 * 1024   # per-buffer tile target (~8 MiB)
VMEM_LIMIT_BYTES = 48 * 1024 * 1024   # explicit cap: safe on v5e/v6e/v7x


def _rezero_kernel(g_ref, x_ref, o_ref):
    # g_ref: (1,) f32 scalar in SMEM; x_ref/o_ref: (tile_r, lanes) tile in VMEM.
    g = g_ref[0]                               # hoist the SMEM scalar read
    # fn = identity; any elementwise fn(x_ref[...]) would be fused on this line.
    o_ref[...] = (x_ref[...] * g).astype(o_ref.dtype)


def _pick_tile_rows(rows, lanes, itemsize):
    """Rows per tile: multiple of 8 (or == rows), ~TARGET_TILE_BYTES per buffer,
    and >= 2 grid steps when rows permit so both v7x TensorCores get work."""
    target = max(8, TARGET_TILE_BYTES // max(1, lanes * itemsize))
    target = (target // 8) * 8
    if rows <= target:
        if rows >= 16:
            # Split into exactly 2 blocks (second may be edge-masked).
            half = pl.cdiv(rows, 2)
            return ((half + 7) // 8) * 8
        return rows                      # single block == full dim (8,128)-OK
    # rows > target: try to find a multiple-of-8 tile near target dividing rows
    # (avoids a masked partial final block); otherwise accept the masked block.
    for t in range(target, max(7, target // 2), -8):
        if rows % t == 0:
            return t
    return target


def rezero(x, g, *, donate_x=False):
    """x: any-shape float array.  g: scalar (or shape-(1,)) gate parameter."""
    orig_shape = x.shape
    dtype = x.dtype
    total = x.size
    if total == 0:
        return x
    itemsize = jnp.dtype(dtype).itemsize
    g = jnp.asarray(g, dtype=jnp.float32).reshape((1,))

    # Lane-dense 2-D view of x — a free reshape, never a pad/copy.
    if total % 128 == 0:
        lanes = 512 if total % 512 == 0 else (256 if total % 256 == 0 else 128)
    else:
        # Ragged total: keep the native (prod(leading), last_dim) view.
        # TODO(synk): lanes < 128 here means masked partial-width stores; it is
        # correct and adds zero extra HBM passes for oddly-shaped tensors.
        lanes = orig_shape[-1] if x.ndim >= 1 else 1
    rows = total // lanes
    x2 = x.reshape(rows, lanes)

    tile_r = _pick_tile_rows(rows, lanes, itemsize)
    grid = (pl.cdiv(rows, tile_r),)

    out2 = pl.pallas_call(
        _rezero_kernel,
        out_shape=jax.ShapeDtypeStruct((rows, lanes), dtype),
        grid=grid,
        in_specs=[
            pl.BlockSpec(memory_space=pltpu.MemorySpace.SMEM),   # scalar gate g
            pl.BlockSpec((tile_r, lanes), lambda i: (i, 0)),     # x tile
        ],
        out_specs=pl.BlockSpec((tile_r, lanes), lambda i: (i, 0)),
        compiler_params=pltpu.CompilerParams(
            dimension_semantics=(pltpu.PARALLEL,),   # shard rows across v7x TCs
            vmem_limit_bytes=VMEM_LIMIT_BYTES,
        ),
        cost_estimate=pl.CostEstimate(
            flops=total,
            transcendentals=0,
            bytes_accessed=2 * total * itemsize,
        ),
        input_output_aliases=({1: 0} if donate_x else {}),
    )(g, x2)

    return out2.reshape(orig_shape)


if __name__ == "__main__":
    key = jax.random.PRNGKey(0)
    x = jax.random.normal(key, (2, 4, 16, 16), dtype=jnp.float32)   # NCHW

    # Parameter g: PyTorch init is 0.0 (the point of Rezero).
    g0 = jnp.zeros((1,), dtype=jnp.float32)
    out0 = jax.block_until_ready(rezero(x, g0))
    assert out0.shape == x.shape and out0.dtype == x.dtype
    assert jnp.allclose(out0, jnp.zeros_like(x))

    # Non-trivial gate value.
    gv = jnp.array([0.37], dtype=jnp.float32)
    out1 = jax.block_until_ready(rezero(x, gv))
    assert jnp.allclose(out1, x * 0.37, atol=1e-6, rtol=1e-6)

    # 128-aligned but not 512-aligned total (2176 elems): lanes=128, rows=17,
    # 2-step grid with an edge-masked final block — no pad / slice anywhere.
    y = jax.random.normal(jax.random.PRNGKey(1), (2, 4, 16, 17), dtype=jnp.float32)
    out2 = jax.block_until_ready(rezero(y, gv))
    assert out2.shape == y.shape
    assert jnp.allclose(out2, y * 0.37, atol=1e-6, rtol=1e-6)

    # Truly ragged total (105 elems): native-last-dim view path, zero copies.
    z = jax.random.normal(jax.random.PRNGKey(2), (3, 5, 7), dtype=jnp.float32)
    out3 = jax.block_until_ready(rezero(z, gv))
    assert out3.shape == z.shape
    assert jnp.allclose(out3, z * 0.37, atol=1e-6, rtol=1e-6)

    # bf16 input with f32 gate: exercises the explicit output-dtype cast.
    xb = x.astype(jnp.bfloat16)
    out4 = jax.block_until_ready(rezero(xb, gv))
    assert out4.shape == xb.shape and out4.dtype == jnp.bfloat16
    assert jnp.allclose(out4.astype(jnp.float32),
                        xb.astype(jnp.float32) * 0.37, atol=2e-2, rtol=2e-2)

    print("KERNEL_OK")
</pallas_src>

<mosaic_0001>
module attributes {stable_mosaic.version = 11 : i64} {
  func.func @_rezero_kernel(%arg0: i32, %arg1: memref<1xf32, #tpu.memory_space<smem>>, %arg2: memref<4x512xf32, #tpu.memory_space<vmem>>, %arg3: memref<4x512xf32, #tpu.memory_space<vmem>>) attributes {dimension_semantics = [#tpu.dimension_semantics<parallel>], iteration_bounds = array<i64: 1>, scalar_prefetch = 0 : i64, scratch_operands = 0 : i64, tpu.core_type = #tpu.core_type<tc>, window_params = [{transform_indices = @transform_0, window_bounds = array<i64: 1>}, {transform_indices = @transform_1, window_bounds = array<i64: 4, 512>}, {transform_indices = @transform_2, window_bounds = array<i64: 4, 512>}]} {
    %c0 = arith.constant 0 : index
    %0 = memref.load %arg1[%c0] : memref<1xf32, #tpu.memory_space<smem>>
    %c0_0 = arith.constant 0 : index
    %c0_1 = arith.constant 0 : index
    %1 = vector.load %arg2[%c0_0, %c0_1] : memref<4x512xf32, #tpu.memory_space<vmem>>, vector<4x512xf32>
    %2 = vector.broadcast %0 : f32 to vector<4x512xf32>
    %3 = arith.mulf %1, %2 : vector<4x512xf32>
    %c0_2 = arith.constant 0 : index
    %c0_3 = arith.constant 0 : index
    %4 = vector.load %arg3[%c0_2, %c0_3] : memref<4x512xf32, #tpu.memory_space<vmem>>, vector<4x512xf32>
    tpu.vector_store %arg3[%c0_2, %c0_3], %3 {strides = array<i32>} : memref<4x512xf32, #tpu.memory_space<vmem>>, vector<4x512xf32>,
    return
  }
  func.func @transform_0(%arg0: i32) -> i32 {
    %c0_i32 = arith.constant 0 : i32
    %c0_i32_0 = arith.constant 0 : i32
    return %c0_i32 : i32
  }
  func.func @transform_1(%arg0: i32) -> (i32, i32) {
    %c0_i32 = arith.constant 0 : i32
    %c0_i32_0 = arith.constant 0 : i32
    return %arg0, %c0_i32 : i32, i32
  }
  func.func @transform_2(%arg0: i32) -> (i32, i32) {
    %c0_i32 = arith.constant 0 : i32
    %c0_i32_0 = arith.constant 0 : i32
    return %arg0, %c0_i32 : i32, i32
  }
}

</mosaic_0001>

<bundles_post_ra>
// kernel: tpu_custom_call.1
= control target key start
LH: loop header
LB: loop body
LE: loop exit
PB: predicated region body
PF: predicated region fallthrough
CT: control target
= control target key end

     0   :  { %8 = vsyncpa [#allocation4], 0  ;;  %s120_s0 = inlined_call_operand.<no memory space> [shape: f32[1], index: 0, kind: input, shape index: {}]   ;;  %s121_s1 = inlined_call_operand.hbm [shape: f32[4,512], index: 1, kind: input, shape index: {}]   ;;  %s122_s2 = inlined_call_operand.hbm [shape: f32[4,512], index: 2, kind: output, shape index: {}]  }
   0x1   :  { %9 = vsyncpa [#allocation5], 0  ;;  %s94_s9 = smov [#allocation3]  }
   0x2   :  { %s18_s10 = sshll.u32 %s94_s9, 4  ;;  %s19_s10 = int_to_ptr.vmem [resolvable:$true] %s18_s10 }
   0x3   :  { %s58_s11 = scalar_lea.vmem %s19_s10, 256  ;;  %p63_p1 = scmp.lt.s32.totalorder %s19_s10, %s19_s10 }
   0x4   :  { %p59_p0 = scmp.ne.s32.totalorder %s19_s10, %s58_s11  ;;  %p64_p2 = scmp.lt.s32.totalorder %s58_s11, %s58_s11 }
   0x6   :  { %p65_p3 = por %p64_p2, %p63_p1 }
   0x8   :  { %p66_p4 = pnand %p65_p3, %p59_p0 }
   0xa   :  { %69 = shalt.err (!%p66_p4)
}
   0xb   :  { %21 = dma.hbm_to_vmem [thread:$0]  %s121_s1, 256, %s19_s10, [#allocation4]  }
   0xc   :  { %90 = dma.done.wait [#allocation4], 256  }
   0xd   :  { %91 = vsyncadd [#allocation4], 4294967040  ;;  %v28_v0 = vstv %s120_s0  ;;  %s95_s16 = smov [#allocation6]   ;;  %v26_v1 = vld [vmem:[#allocation3] sm:$0xff]  ;;  %v27_v2 = vld [vmem:[#allocation3 + $0x8] sm:$0xff] }
   0xe   :  { %s39_s17 = sshll.u32 %s95_s16, 4  ;;  %v29_v3 = vmul.f32 %v28_v0, %v26_v1  ;;  %v30_v4 = vmul.f32 %v28_v0, %v27_v2  ;;  %s40_s17 = int_to_ptr.vmem [resolvable:$true] %s39_s17 }
   0xf   :  { %s70_s18 = scalar_lea.vmem %s40_s17, 256  ;;  %p75_p6 = scmp.lt.s32.totalorder %s40_s17, %s40_s17 }
  0x10   :  { %31 = vst [vmem:[#allocation6] sm:$0xff] %v29_v3  ;;  %32 = vst [vmem:[#allocation6 + $0x8] sm:$0xff] %v30_v4  ;;  %p71_p5 = scmp.ne.s32.totalorder %s40_s17, %s70_s18  ;;  %p76_p7 = scmp.lt.s32.totalorder %s70_s18, %s70_s18 }
  0x12   :  { %p77_p8 = por %p76_p7, %p75_p6 }
  0x14   :  { %p78_p9 = pnand %p77_p8, %p71_p5 }
  0x16   :  { %81 = shalt.err (!%p78_p9)
}
  0x17   :  { %42 = dma.vmem_to_hbm [thread:$0]  %s40_s17, 256, %s122_s2, [#allocation5]  }
  0x18   :  { %92 = dma.done.wait [#allocation5], 256  }
  0x19   :  { %93 = vsyncadd [#allocation5], 4294967040 }
  0x1a   :  { %46 = vsyncpa [#allocation4], 1 }
  0x1b   :  { %47 = vsyncpa [#allocation5], 1 }

</bundles_post_ra>
